<compile_context>
chip_gen: v7x
topology: tpu7x:2x2x1
jax: 0.10.0
libtpu: 0.0.40
codegen_flags: <defaults>
</compile_context>

<pallas_src>
import jax
import jax.numpy as jnp
from jax.experimental import pallas as pl
from jax.experimental.pallas import tpu as pltpu

inputdim = 2
hidden1dim = 20
hidden2dim = 20
outputdim = 2

FEAT = 32          # padded feature width (multiple of 8 sublanes)
NUM_LAYERS = 4


def mlp_kernel(x_ref, w_ref, b_ref, o_ref):
    """Fused 4-layer MLP, batch on the lane axis.

    x_ref : (inputdim, tile_n)    input tile  (batch on lanes)
    w_ref : (4, FEAT, FEAT)       zero-padded weight slab, torch layout (out, in)
    b_ref : (4, FEAT, 1)          zero-padded bias slab
    o_ref : (outputdim, tile_n)   output tile (batch on lanes)
    """
    x = x_ref[...].astype(jnp.float32)                       # (2, tile_n)

    # Layer 0: keep the true contraction size (K=2) by slicing the slab.
    # TODO(synk): K=2 could be 2 VPU broadcast-FMAs instead of an MXU dot;
    # kept on the MXU for exact numerical consistency with the XLA reference.
    w0 = w_ref[0]                                            # (FEAT, FEAT)
    h = jnp.dot(w0[:, :inputdim], x,
                preferred_element_type=jnp.float32) + b_ref[0]
    h = jnp.tanh(h)                                          # (FEAT, tile_n)

    # Layers 1-2: full padded-slab matmuls; padded rows/cols are zero and
    # tanh(0) = 0, so the padded rows stay exactly zero throughout.
    h = jnp.tanh(jnp.dot(w_ref[1], h,
                         preferred_element_type=jnp.float32) + b_ref[1])
    h = jnp.tanh(jnp.dot(w_ref[2], h,
                         preferred_element_type=jnp.float32) + b_ref[2])

    # Output layer (no activation); keep only the real output rows so the
    # store stays lane-dense (last dim = tile_n).
    out = jnp.dot(w_ref[3], h, preferred_element_type=jnp.float32) + b_ref[3]
    o_ref[...] = out[:outputdim, :].astype(o_ref.dtype)


def pack_params(params):
    """Pack torch-layout (out, in) weights / (out,) biases into padded slabs."""
    wpack = jnp.zeros((NUM_LAYERS, FEAT, FEAT), jnp.float32)
    bpack = jnp.zeros((NUM_LAYERS, FEAT, 1), jnp.float32)
    dims = [(hidden1dim, inputdim),
            (hidden2dim, hidden1dim),
            (hidden2dim, hidden2dim),
            (outputdim, hidden2dim)]
    for l, (fan_out, fan_in) in enumerate(dims):
        wpack = wpack.at[l, :fan_out, :fan_in].set(params[f"w{l}"])
        bpack = bpack.at[l, :fan_out, 0].set(params[f"b{l}"])
    return wpack, bpack


def network_forward(x, wpack, bpack, *, tile_n=1024):
    """x: (N, inputdim) -> (N, outputdim). Weights via pack_params()."""
    N, D = x.shape
    assert D == inputdim

    # Transposed layout: batch on the lane (last) axis.
    xT = jnp.transpose(x).astype(jnp.float32)                # (inputdim, N)

    if N <= tile_n:
        tile = N                                             # single grid step
        n_pad = N
    else:
        assert tile_n % 128 == 0, "tile_n must be a multiple of 128"
        tile = tile_n
        n_pad = pl.cdiv(N, tile) * tile
        if n_pad != N:
            xT = jnp.pad(xT, ((0, 0), (0, n_pad - N)))

    grid = (n_pad // tile,)

    outT = pl.pallas_call(
        mlp_kernel,
        out_shape=jax.ShapeDtypeStruct((outputdim, n_pad), x.dtype),
        grid_spec=pltpu.PrefetchScalarGridSpec(
            num_scalar_prefetch=0,
            grid=grid,
            in_specs=[
                pl.BlockSpec((inputdim, tile), lambda i: (0, i)),      # x tile
                pl.BlockSpec(wpack.shape, lambda i: (0, 0, 0)),        # resident
                pl.BlockSpec(bpack.shape, lambda i: (0, 0, 0)),        # resident
            ],
            out_specs=pl.BlockSpec((outputdim, tile), lambda i: (0, i)),
        ),
        compiler_params=pltpu.CompilerParams(
            dimension_semantics=("parallel",)),
    )(xT, wpack, bpack)

    return jnp.transpose(outT[:, :N])                        # (N, outputdim)


def init_params(key):
    """Deterministic init mimicking torch.nn.Linear's U(-1/sqrt(fan_in), +)."""
    dims = [(hidden1dim, inputdim),
            (hidden2dim, hidden1dim),
            (hidden2dim, hidden2dim),
            (outputdim, hidden2dim)]
    params = {}
    for idx, (fan_out, fan_in) in enumerate(dims):
        key, kw, kb = jax.random.split(key, 3)
        bound = 1.0 / jnp.sqrt(fan_in)
        params[f"w{idx}"] = jax.random.uniform(
            kw, (fan_out, fan_in), jnp.float32, -bound, bound)
        params[f"b{idx}"] = jax.random.uniform(
            kb, (fan_out,), jnp.float32, -bound, bound)
    return params


if __name__ == "__main__":
    key = jax.random.PRNGKey(0)
    params = init_params(key)
    wpack, bpack = pack_params(params)

    # Mimic the original: x = stack(meshgrid(x1, x2), dim=2).view(-1, 2)
    n1, n2 = 8, 8
    x1 = jnp.linspace(-1.0, 1.0, n1)
    x2 = jnp.linspace(-1.0, 1.0, n2)
    x1_mesh, x2_mesh = jnp.meshgrid(x1, x2, indexing="ij")
    x = jnp.stack((x1_mesh, x2_mesh), axis=2).reshape(-1, 2).astype(jnp.float32)

    out = network_forward(x, wpack, bpack)
    jax.block_until_ready(out)

    # Pure-JAX reference check (torch layout: y = x @ W.T + b)
    def ref(x, p):
        h = jnp.tanh(x @ p["w0"].T + p["b0"])
        h = jnp.tanh(h @ p["w1"].T + p["b1"])
        h = jnp.tanh(h @ p["w2"].T + p["b2"])
        return h @ p["w3"].T + p["b3"]

    expected = ref(x, params)
    assert out.shape == (64, outputdim)
    assert jnp.allclose(out, expected, atol=1e-5, rtol=1e-5)

    print("KERNEL_OK")
</pallas_src>

<mosaic_0001>
module attributes {stable_mosaic.version = 11 : i64} {
  func.func @mlp_kernel(%arg0: i32, %arg1: memref<2x64xf32, #tpu.memory_space<vmem>>, %arg2: memref<4x32x32xf32, #tpu.memory_space<vmem>>, %arg3: memref<4x32x1xf32, #tpu.memory_space<vmem>>, %arg4: memref<2x64xf32, #tpu.memory_space<vmem>>) attributes {dimension_semantics = [#tpu.dimension_semantics<parallel>], iteration_bounds = array<i64: 1>, scalar_prefetch = 0 : i64, scratch_operands = 0 : i64, tpu.core_type = #tpu.core_type<tc>, window_params = [{transform_indices = @transform_0, window_bounds = array<i64: 2, 64>}, {pipeline_mode = #tpu.pipeline_mode<synchronous>, transform_indices = @transform_1, window_bounds = array<i64: 4, 32, 32>}, {pipeline_mode = #tpu.pipeline_mode<synchronous>, transform_indices = @transform_2, window_bounds = array<i64: 4, 32, 1>}, {transform_indices = @transform_3, window_bounds = array<i64: 2, 64>}]} {
    %c0 = arith.constant 0 : index
    %c0_0 = arith.constant 0 : index
    %0 = vector.load %arg1[%c0, %c0_0] : memref<2x64xf32, #tpu.memory_space<vmem>>, vector<2x64xf32>
    %c0_1 = arith.constant 0 : index
    %c0_2 = arith.constant 0 : index
    %c0_3 = arith.constant 0 : index
    %1 = vector.load %arg2[%c0_1, %c0_2, %c0_3] : memref<4x32x32xf32, #tpu.memory_space<vmem>>, vector<1x32x32xf32>
    %2 = vector.shape_cast %1 : vector<1x32x32xf32> to vector<32x32xf32>
    %3 = vector.extract_strided_slice %2 {offsets = [0, 0], sizes = [32, 2], strides = [1, 1]} : vector<32x32xf32> to vector<32x2xf32>
    %cst = arith.constant dense<0.000000e+00> : vector<32x64xf32>
    %4 = tpu.matmul %3, %0, %cst {dimension_numbers = #tpu.dot_dimension_numbers<[1], [0], [0], [1], [0, 0, 1, 1], [], []>} : vector<32x2xf32>, vector<2x64xf32>, vector<32x64xf32> -> vector<32x64xf32>
    %c0_4 = arith.constant 0 : index
    %c0_5 = arith.constant 0 : index
    %c0_6 = arith.constant 0 : index
    %5 = vector.load %arg3[%c0_4, %c0_5, %c0_6] : memref<4x32x1xf32, #tpu.memory_space<vmem>>, vector<1x32x1xf32>
    %6 = vector.shape_cast %5 : vector<1x32x1xf32> to vector<32x1xf32>
    %7 = vector.broadcast %6 : vector<32x1xf32> to vector<32x64xf32>
    %8 = arith.addf %4, %7 : vector<32x64xf32>
    %9 = math.tanh %8 : vector<32x64xf32>
    %c1 = arith.constant 1 : index
    %c0_7 = arith.constant 0 : index
    %c0_8 = arith.constant 0 : index
    %10 = vector.load %arg2[%c1, %c0_7, %c0_8] : memref<4x32x32xf32, #tpu.memory_space<vmem>>, vector<1x32x32xf32>
    %11 = vector.shape_cast %10 : vector<1x32x32xf32> to vector<32x32xf32>
    %cst_9 = arith.constant dense<0.000000e+00> : vector<32x64xf32>
    %12 = tpu.matmul %11, %9, %cst_9 {dimension_numbers = #tpu.dot_dimension_numbers<[1], [0], [0], [1], [0, 0, 1, 1], [], []>} : vector<32x32xf32>, vector<32x64xf32>, vector<32x64xf32> -> vector<32x64xf32>
    %c1_10 = arith.constant 1 : index
    %c0_11 = arith.constant 0 : index
    %c0_12 = arith.constant 0 : index
    %13 = vector.load %arg3[%c1_10, %c0_11, %c0_12] : memref<4x32x1xf32, #tpu.memory_space<vmem>>, vector<1x32x1xf32>
    %14 = vector.shape_cast %13 : vector<1x32x1xf32> to vector<32x1xf32>
    %15 = vector.broadcast %14 : vector<32x1xf32> to vector<32x64xf32>
    %16 = arith.addf %12, %15 : vector<32x64xf32>
    %17 = math.tanh %16 : vector<32x64xf32>
    %c2 = arith.constant 2 : index
    %c0_13 = arith.constant 0 : index
    %c0_14 = arith.constant 0 : index
    %18 = vector.load %arg2[%c2, %c0_13, %c0_14] : memref<4x32x32xf32, #tpu.memory_space<vmem>>, vector<1x32x32xf32>
    %19 = vector.shape_cast %18 : vector<1x32x32xf32> to vector<32x32xf32>
    %cst_15 = arith.constant dense<0.000000e+00> : vector<32x64xf32>
    %20 = tpu.matmul %19, %17, %cst_15 {dimension_numbers = #tpu.dot_dimension_numbers<[1], [0], [0], [1], [0, 0, 1, 1], [], []>} : vector<32x32xf32>, vector<32x64xf32>, vector<32x64xf32> -> vector<32x64xf32>
    %c2_16 = arith.constant 2 : index
    %c0_17 = arith.constant 0 : index
    %c0_18 = arith.constant 0 : index
    %21 = vector.load %arg3[%c2_16, %c0_17, %c0_18] : memref<4x32x1xf32, #tpu.memory_space<vmem>>, vector<1x32x1xf32>
    %22 = vector.shape_cast %21 : vector<1x32x1xf32> to vector<32x1xf32>
    %23 = vector.broadcast %22 : vector<32x1xf32> to vector<32x64xf32>
    %24 = arith.addf %20, %23 : vector<32x64xf32>
    %25 = math.tanh %24 : vector<32x64xf32>
    %c3 = arith.constant 3 : index
    %c0_19 = arith.constant 0 : index
    %c0_20 = arith.constant 0 : index
    %26 = vector.load %arg2[%c3, %c0_19, %c0_20] : memref<4x32x32xf32, #tpu.memory_space<vmem>>, vector<1x32x32xf32>
    %27 = vector.shape_cast %26 : vector<1x32x32xf32> to vector<32x32xf32>
    %cst_21 = arith.constant dense<0.000000e+00> : vector<32x64xf32>
    %28 = tpu.matmul %27, %25, %cst_21 {dimension_numbers = #tpu.dot_dimension_numbers<[1], [0], [0], [1], [0, 0, 1, 1], [], []>} : vector<32x32xf32>, vector<32x64xf32>, vector<32x64xf32> -> vector<32x64xf32>
    %c3_22 = arith.constant 3 : index
    %c0_23 = arith.constant 0 : index
    %c0_24 = arith.constant 0 : index
    %29 = vector.load %arg3[%c3_22, %c0_23, %c0_24] : memref<4x32x1xf32, #tpu.memory_space<vmem>>, vector<1x32x1xf32>
    %30 = vector.shape_cast %29 : vector<1x32x1xf32> to vector<32x1xf32>
    %31 = vector.broadcast %30 : vector<32x1xf32> to vector<32x64xf32>
    %32 = arith.addf %28, %31 : vector<32x64xf32>
    %33 = vector.extract_strided_slice %32 {offsets = [0, 0], sizes = [2, 64], strides = [1, 1]} : vector<32x64xf32> to vector<2x64xf32>
    %c0_25 = arith.constant 0 : index
    %c0_26 = arith.constant 0 : index
    %34 = vector.load %arg4[%c0_25, %c0_26] : memref<2x64xf32, #tpu.memory_space<vmem>>, vector<2x64xf32>
    tpu.vector_store %arg4[%c0_25, %c0_26], %33 {strides = array<i32>} : memref<2x64xf32, #tpu.memory_space<vmem>>, vector<2x64xf32>,
    return
  }
  func.func @transform_0(%arg0: i32) -> (i32, i32) {
    %c0_i32 = arith.constant 0 : i32
    %c0_i32_0 = arith.constant 0 : i32
    return %c0_i32, %arg0 : i32, i32
  }
  func.func @transform_1(%arg0: i32) -> (i32, i32, i32) {
    %c0_i32 = arith.constant 0 : i32
    %c0_i32_0 = arith.constant 0 : i32
    %c0_i32_1 = arith.constant 0 : i32
    %c0_i32_2 = arith.constant 0 : i32
    return %c0_i32, %c0_i32_0, %c0_i32_1 : i32, i32, i32
  }
  func.func @transform_2(%arg0: i32) -> (i32, i32, i32) {
    %c0_i32 = arith.constant 0 : i32
    %c0_i32_0 = arith.constant 0 : i32
    %c0_i32_1 = arith.constant 0 : i32
    %c0_i32_2 = arith.constant 0 : i32
    return %c0_i32, %c0_i32_0, %c0_i32_1 : i32, i32, i32
  }
  func.func @transform_3(%arg0: i32) -> (i32, i32) {
    %c0_i32 = arith.constant 0 : i32
    %c0_i32_0 = arith.constant 0 : i32
    return %c0_i32, %arg0 : i32, i32
  }
}

</mosaic_0001>

<bundles_post_ra>
// kernel: tpu_custom_call.1
= control target key start
LH: loop header
LB: loop body
LE: loop exit
PB: predicated region body
PF: predicated region fallthrough
CT: control target
= control target key end

     0   :  { %vm57_vm0 = vcmask 1041408   ;;  %vm44_vm1 = vcmask 15360   ;;  %v750_v5 = vmov 0   ;;  %s890_s0 = inlined_call_operand.vmem [shape: f32[2,64], index: 0, kind: input, shape index: {}]   ;;  %s891_s1 = inlined_call_operand.vmem [shape: f32[4,32,32], index: 1, kind: input, shape index: {}]   ;;  %s892_s2 = inlined_call_operand.vmem [shape: f32[4,32,1], index: 2, kind: input, shape index: {}]   ;;  %s893_s3 = inlined_call_operand.hbm [shape: f32[2,64], index: 3, kind: output, shape index: {}]  }
   0x1   :  { %v15_v0 = vld [vmem:[%s890_s0] sm:$0x3]  ;;  %v17_v2 = vld [vmem:[%s891_s1 + $0x8] sm:$0xff]  ;;  %v18_v3 = vld [vmem:[%s891_s1 + $0x10] sm:$0xff]  ;;  %700 = vset.pattern.permute.xlu0 %v750_v5  ;;  %701 = vset.pattern.permute.xlu1 %v750_v5 }
   0x2   :  { %v16_v1 = vld [vmem:[%s891_s1] sm:$0xff]  ;;  %620 = vmatprep.subr.msk.mxu0 %vm57_vm0, %v15_v0  ;;  %v22_v6 = vld [vmem:[%s892_s2 + $0x10] sm:$0xff]  ;;  %v19_v7 = vld [vmem:[%s891_s1 + $0x18] sm:$0xff] }
   0x3   :  { %622 = vmatprep.mubr.msk.f32.mxu0 %vm44_vm1, %v16_v1  ;;  %v20_v4 = vld [vmem:[%s892_s2] sm:$0xff]  ;;  %621 = vmatpush3.msk.msra.mxu0 %vm57_vm0, %v15_v0  ;;  %v21_v8 = vld [vmem:[%s892_s2 + $0x8] sm:$0xff]  ;;  %v23_v9 = vld [vmem:[%s892_s2 + $0x18] sm:$0xff] }
   0x4   :  { %623 = vmatmul.mubr.msk.f32.vlgmr.msra.gmra.mrb[0].mxu0 %vm44_vm1, %v17_v2  ;;  %26 = vperm.xlu0 %700, %v20_v4  }
   0x5   :  { %625 = vmatprep.mubr.msk.f32.mxu0 %vm44_vm1, %v18_v3  ;;  %36 = vperm.xlu1 %701, %v22_v6  }
   0x6   :  { %8 = vsyncpa [#allocation3], 0  ;;  %v559_v10 = vld [vmem:[%s892_s2 + $0x20] sm:$0xff]  ;;  %v560_v11 = vld [vmem:[%s892_s2 + $0x28] sm:$0xff]  ;;  %vm180_vm2 = vcmask 261120   ;;  %s751_s15 = smov [#allocation2]  }
   0x7   :  { %v561_v12 = vld [vmem:[%s892_s2 + $0x30] sm:$0xff]  ;;  %v562_v13 = vld [vmem:[%s892_s2 + $0x38] sm:$0xff]  ;;  %v571_v14 = vld [vmem:[%s892_s2 + $0x40] sm:$0xff]  ;;  %s542_s16 = sshll.u32 %s751_s15, 4  ;;  %vm534_vm3 = vcmask 517120   ;;  %s543_s16 = int_to_ptr.vmem [resolvable:$true] %s542_s16 }
   0x8   :  { %626 = vmatmul.mubr.msk.f32.gmra.mrb[2].mxu0 %vm44_vm1, %v19_v7  ;;  %31 = vperm.xlu0 %700, %v21_v8   ;;  %v572_v15 = vld [vmem:[%s892_s2 + $0x48] sm:$0xff]  ;;  %v573_v16 = vld [vmem:[%s892_s2 + $0x50] sm:$0xff]  ;;  %v574_v17 = vld [vmem:[%s892_s2 + $0x58] sm:$0xff]  ;;  %s726_s17 = scalar_lea.vmem %s543_s16, 32  ;;  %p731_p1 = scmp.lt.s32.totalorder %s543_s16, %s543_s16 }
   0x9   :  { %41 = vperm.xlu1 %701, %v23_v9   ;;  %v583_v18 = vld [vmem:[%s892_s2 + $0x60] sm:$0xff]  ;;  %v556_v38 = vld [vmem:[%s891_s1 + $0x28] sm:$0xff]  ;;  %v557_v39 = vld [vmem:[%s891_s1 + $0x30] sm:$0xff]  ;;  %p727_p0 = scmp.ne.s32.totalorder %s543_s16, %s726_s17  ;;  %p732_p2 = scmp.lt.s32.totalorder %s726_s17, %s726_s17 }
   0xa   :  { %v555_v19 = vld [vmem:[%s891_s1 + $0x20] sm:$0xff]  ;;  %v558_v40 = vld [vmem:[%s891_s1 + $0x38] sm:$0xff]  ;;  %v568_v60 = vld [vmem:[%s891_s1 + $0x48] sm:$0xff] }
   0xb   :  { %636 = vmatprep.mubr.msk.f32.mxu1 %vm180_vm2, %v555_v19  ;;  %v567_v41 = vld [vmem:[%s891_s1 + $0x40] sm:$0xff]  ;;  %v569_v61 = vld [vmem:[%s891_s1 + $0x50] sm:$0xff]  ;;  %v570_v62 = vld [vmem:[%s891_s1 + $0x58] sm:$0xff]  ;;  %p733_p3 = por %p732_p2, %p731_p1 }
   0xc   :  { %162 = vperm.xlu0 %700, %v559_v10   ;;  %650 = vmatprep.mubr.msk.f32.mxu0 %vm180_vm2, %v567_v41  ;;  %v579_v63 = vld [vmem:[%s891_s1 + $0x60] sm:$0xff]  ;;  %v581_v0 = vld [vmem:[%s891_s1 + $0x70] sm:$0xff]  ;;  %v580_v19 = vld [vmem:[%s891_s1 + $0x68] sm:$0xff] }
   0xd   :  { %167 = vperm.xlu1 %701, %v560_v11   ;;  %p734_p4 = pnand %p733_p3, %p727_p0 }
  0x10   :  { %172 = vperm.xlu0 %700, %v561_v12  }
  0x11   :  { %177 = vperm.xlu1 %701, %v562_v13  }
  0x14   :  { %294 = vperm.xlu0 %700, %v571_v14  }
  0x15   :  { %299 = vperm.xlu1 %701, %v572_v15  }
  0x18   :  { %304 = vperm.xlu0 %700, %v573_v16  }
  0x19   :  { %309 = vperm.xlu1 %701, %v574_v17  }
  0x1c   :  { %425 = vperm.xlu0 %700, %v583_v18  }
  0x83   :  { %v27_v20 = vpop.permute.xlu0 %26 }
  0x84   :  { %v37_v21 = vpop.permute.xlu1 %36 }
  0x87   :  { %v32_v22 = vpop.permute.xlu0 %31 }
  0x88   :  { %v42_v27 = vpop.permute.xlu1 %41 }
  0x8b   :  { %v163_v43 = vpop.permute.xlu0 %162 }
  0x8c   :  { %v168_v42 = vpop.permute.xlu1 %167 }
  0x8f   :  { %v173_v50 = vpop.permute.xlu0 %172 }
  0x90   :  { %v178_v48 = vpop.permute.xlu1 %177 }
  0x93   :  { %v295_v2 = vpop.permute.xlu0 %294 }
  0x94   :  { %v300_v1 = vpop.permute.xlu1 %299 }
  0x97   :  { %v305_v9 = vpop.permute.xlu0 %304 }
  0x98   :  { %v310_v7 = vpop.permute.xlu1 %309 }
  0xd7   :  { %v624_v23 = vpop.f32.mrb[0].mxu0 }
  0xd8   :  { %v133_v24 = vadd.f32 %v624_v23, %v32_v22  ;;  %v127_v25 = vpop.f32.mrb[1].mxu0 }
  0xd9   :  { %v128_v26 = vadd.f32 %v127_v25, %v27_v20  ;;  %v582_v20 = vld [vmem:[%s891_s1 + $0x78] sm:$0xff] }
  0xda   :  { %702 = vtanh.f32 %v133_v24 }
  0xdb   :  { %704 = vtanh.f32 %v128_v26  ;;  %v627_v28 = vpop.f32.mrb[2].mxu0 }
  0xdc   :  { %v143_v29 = vadd.f32 %v627_v28, %v42_v27  ;;  %v137_v30 = vpop.f32.mrb[3].mxu0 }
  0xdd   :  { %v138_v31 = vadd.f32 %v137_v30, %v37_v21  ;;  %v426_v21 = vpop.permute.xlu0 %425 }
  0xde   :  { %706 = vtanh.f32 %v143_v29 }
  0xdf   :  { %708 = vtanh.f32 %v138_v31 }
  0xe4   :  { %v703_v32 = vpop.eup %702 }
  0xe5   :  { %v705_v33 = vpop.eup %704 }
  0xe6   :  { %v670_v34 = vpack.c.bf16 %v703_v32, %v705_v33 }
  0xe8   :  { %v707_v35 = vpop.eup %706  ;;  %671 = vmatprep.subr.bf16.mxu1 %v670_v34 }
  0xe9   :  { %v709_v36 = vpop.eup %708  ;;  %673 = vmatpush3.bf16.msra.mxu1 %v670_v34 }
  0xea   :  { %v674_v37 = vpack.c.bf16 %v707_v35, %v709_v36 }
  0xec   :  { %675 = vmatprep.subr.bf16.mxu1 %v674_v37 }
  0xed   :  { %677 = vmatpush3.bf16.msra.mxu1 %v674_v37 }
  0xf0   :  { %637 = vmatmul.mubr.msk.f32.vlgmr.msra.gmra.mrb[0].mxu1 %vm180_vm2, %v556_v38 }
  0xf1   :  { %639 = vmatprep.mubr.msk.f32.mxu1 %vm180_vm2, %v557_v39 }
  0xf4   :  { %640 = vmatmul.mubr.msk.f32.gmra.mrb[2].mxu1 %vm180_vm2, %v558_v40 }
  0xf5   :  { %667 = vmatprep.mubr.msk.f32.mxu1 %vm180_vm2, %v581_v0 }
 0x1c3   :  { %v638_v44 = vpop.f32.mrb[0].mxu1 }
 0x1c4   :  { %v265_v45 = vadd.f32 %v638_v44, %v168_v42  ;;  %v259_v46 = vpop.f32.mrb[1].mxu1 }
 0x1c5   :  { %v260_v47 = vadd.f32 %v259_v46, %v163_v43 }
 0x1c6   :  { %710 = vtanh.f32 %v265_v45 }
 0x1c7   :  { %712 = vtanh.f32 %v260_v47  ;;  %v641_v49 = vpop.f32.mrb[2].mxu1 }
 0x1c8   :  { %v275_v51 = vadd.f32 %v641_v49, %v178_v48  ;;  %v269_v52 = vpop.f32.mrb[3].mxu1 }
 0x1c9   :  { %v270_v53 = vadd.f32 %v269_v52, %v173_v50 }
 0x1ca   :  { %714 = vtanh.f32 %v275_v51 }
 0x1cb   :  { %716 = vtanh.f32 %v270_v53 }
 0x1d0   :  { %v711_v54 = vpop.eup %710 }
 0x1d1   :  { %v713_v55 = vpop.eup %712 }
 0x1d2   :  { %v678_v56 = vpack.c.bf16 %v711_v54, %v713_v55 }
 0x1d4   :  { %v715_v57 = vpop.eup %714  ;;  %679 = vmatprep.subr.bf16.mxu0 %v678_v56 }
 0x1d5   :  { %v717_v58 = vpop.eup %716  ;;  %681 = vmatpush3.bf16.msra.mxu0 %v678_v56 }
 0x1d6   :  { %v682_v59 = vpack.c.bf16 %v715_v57, %v717_v58 }
 0x1d8   :  { %683 = vmatprep.subr.bf16.mxu0 %v682_v59 }
 0x1d9   :  { %685 = vmatpush3.bf16.msra.mxu0 %v682_v59 }
 0x1dc   :  { %651 = vmatmul.mubr.msk.f32.vlgmr.msra.gmra.mrb[4].mxu0 %vm180_vm2, %v568_v60 }
 0x1dd   :  { %653 = vmatprep.mubr.msk.f32.mxu0 %vm180_vm2, %v569_v61 }
 0x1e0   :  { %654 = vmatmul.mubr.msk.f32.gmra.mrb[6].mxu0 %vm180_vm2, %v570_v62 }
 0x1e1   :  { %664 = vmatprep.mubr.msk.f32.mxu0 %vm180_vm2, %v579_v63 }
 0x2af   :  { %v652_v3 = vpop.f32.mrb[4].mxu0 }
 0x2b0   :  { %v396_v4 = vadd.f32 %v652_v3, %v300_v1  ;;  %v390_v5 = vpop.f32.mrb[5].mxu0 }
 0x2b1   :  { %v391_v6 = vadd.f32 %v390_v5, %v295_v2 }
 0x2b2   :  { %718 = vtanh.f32 %v396_v4 }
 0x2b3   :  { %720 = vtanh.f32 %v391_v6  ;;  %v655_v8 = vpop.f32.mrb[6].mxu0 }
 0x2b4   :  { %v406_v10 = vadd.f32 %v655_v8, %v310_v7  ;;  %v400_v11 = vpop.f32.mrb[7].mxu0 }
 0x2b5   :  { %v401_v12 = vadd.f32 %v400_v11, %v305_v9 }
 0x2b6   :  { %722 = vtanh.f32 %v406_v10 }
 0x2b7   :  { %724 = vtanh.f32 %v401_v12 }
 0x2bc   :  { %v719_v13 = vpop.eup %718 }
 0x2bd   :  { %v721_v14 = vpop.eup %720 }
 0x2be   :  { %v686_v15 = vpack.c.bf16 %v719_v13, %v721_v14 }
 0x2c0   :  { %v723_v16 = vpop.eup %722  ;;  %687 = vmatprep.subr.bf16.mxu0 %v686_v15  ;;  %694 = vmatprep.subr.bf16.mxu1 %v686_v15 }
 0x2c1   :  { %v725_v17 = vpop.eup %724  ;;  %689 = vmatpush3.bf16.msra.mxu0 %v686_v15  ;;  %696 = vmatpush3.bf16.msra.mxu1 %v686_v15 }
 0x2c2   :  { %v690_v18 = vpack.c.bf16 %v723_v16, %v725_v17 }
 0x2c4   :  { %691 = vmatprep.subr.bf16.mxu0 %v690_v18  ;;  %695 = vmatprep.subr.bf16.mxu1 %v690_v18 }
 0x2c5   :  { %693 = vmatpush3.bf16.msra.mxu0 %v690_v18  ;;  %697 = vmatpush3.bf16.msra.mxu1 %v690_v18 }
 0x2c8   :  { %665 = vmatmul.mubr.msk.f32.vlgmr.msra.gmra.mrb[8].mxu0 %vm180_vm2, %v580_v19  ;;  %668 = vmatmul.mubr.msk.f32.vlgmr.msra.gmra.mrb[4].mxu1 %vm180_vm2, %v582_v20 }
 0x39b   :  { %v666_v22 = vpop.f32.mrb[8].mxu0  ;;  %v669_v23 = vpop.f32.mrb[4].mxu1 }
 0x39c   :  { %v518_v24 = vpop.f32.mrb[9].mxu0  ;;  %v527_v25 = vpop.f32.mrb[5].mxu1 }
 0x39d   :  { %v519_v26 = vadd.f32 %v518_v24, %v426_v21 }
 0x39f   :  { %535 = vst.msk [vmem:[#allocation2] sm:$0x3] %vm534_vm3, %v519_v26 }
 0x3a0   :  { %737 = shalt.err (!%p734_p4)
}
 0x3a1   :  { %s738_s19 = scalar_lea.hbm %s893_s3, 32 }
 0x3a2   :  { %p739_p5 = scmp.ne.s32.totalorder %s893_s3, %s738_s19  ;;  %p742_p6 = scmp.lt.u32.totalorder %s738_s19, %s893_s3 }
 0x3a4   :  { %p744_p7 = pnand %p742_p6, %p739_p5 }
 0x3a6   :  { %747 = shalt.err (!%p744_p7)
}
 0x3a7   :  { %545 = dma.vmem_to_hbm [thread:$0]  %s543_s16, 32, %s893_s3, [#allocation3]  }
 0x3a8   :  { %748 = dma.done.wait [#allocation3], 32  }
 0x3a9   :  { %749 = vsyncadd [#allocation3], 4294967264 }
 0x3aa   :  { %549 = vsyncpa [#allocation3], 1 }

</bundles_post_ra>
